<compile_context>
chip_gen: v6e
topology: v6e:2x2x1
jax: 0.10.0
libtpu: 0.0.40
codegen_flags: <defaults>
</compile_context>

<pallas_src>
import jax
import jax.numpy as jnp
from jax.experimental import pallas as pl
from jax.experimental.pallas import tpu as pltpu


# ---------------------------------------------------------------------------
# Fused Pallas kernel: projection Linear + reduce_times x (pair-concat Linear)
# ---------------------------------------------------------------------------
def _make_fused_cpc_kernel(reduce_times, tile_rows, feat_dim):
    def kernel(*refs):
        x_ref, wp_ref, bp_ref = refs[0], refs[1], refs[2]
        red = refs[3:3 + 3 * reduce_times]          # (We, Wo, b) per reduce layer
        o_ref = refs[3 + 3 * reduce_times]
        z_ref = refs[4 + 3 * reduce_times]           # (TM, F) f32 VMEM scratch

        # projection layer: (TM, Din)bf16 @ (Din, F)bf16 -> f32, + bias
        z_ref[...] = (
            jnp.dot(x_ref[...], wp_ref[...], preferred_element_type=jnp.float32)
            + bp_ref[...]
        )

        rows = tile_rows
        for l in range(reduce_times):
            we_ref = red[3 * l]       # Wr[:F]  (acts on even / first frame of pair)
            wo_ref = red[3 * l + 1]   # Wr[F:]  (acts on odd / second frame of pair)
            br_ref = red[3 * l + 2]
            half = rows // 2
            # concat([z_even, z_odd]) @ Wr == z_even @ Wr[:F] + z_odd @ Wr[F:]
            z_even = z_ref[pl.ds(0, half, stride=2), :].astype(jnp.bfloat16)
            z_odd = z_ref[pl.ds(1, half, stride=2), :].astype(jnp.bfloat16)
            acc = jnp.dot(z_even, we_ref[...], preferred_element_type=jnp.float32)
            acc = acc + jnp.dot(z_odd, wo_ref[...], preferred_element_type=jnp.float32)
            z_ref[0:half, :] = acc + br_ref[...]
            rows = half

        o_ref[...] = z_ref[0:rows, :].astype(o_ref.dtype)

    return kernel


def _pick_row_tile(n_rows, reduce_times, max_rows):
    """Largest row tile <= max_rows that divides n_rows and is a multiple of
    8 * 2**reduce_times (sublane-aligned output, pair-self-contained tiles)."""
    unit = 8 * (2 ** reduce_times)
    best = None
    t = unit
    limit = min(n_rows, max_rows)
    while t <= limit:
        if n_rows % t == 0:
            best = t
        t += unit
    return best if best is not None else n_rows


# ---------------------------------------------------------------------------
# Parameter init (PyTorch nn.Linear default: U(-1/sqrt(fan_in), +1/sqrt(fan_in)))
# ---------------------------------------------------------------------------
def _linear_init(key, fan_in, fan_out):
    kw, kb = jax.random.split(key)
    bound = 1.0 / (fan_in ** 0.5)
    w = jax.random.uniform(kw, (fan_in, fan_out), jnp.float32, -bound, bound)
    b = jax.random.uniform(kb, (fan_out,), jnp.float32, -bound, bound)
    return w, b


def init_cpc_params(key, input_dim, feat_dim, reduce_times=2):
    keys = jax.random.split(key, reduce_times + 1)
    return {
        "proj": _linear_init(keys[0], input_dim, feat_dim),
        "reduce": [
            _linear_init(keys[i + 1], 2 * feat_dim, feat_dim)
            for i in range(reduce_times)
        ],
    }


# ---------------------------------------------------------------------------
# CPC forward (eval path)
# ---------------------------------------------------------------------------
def cpc_forward(params, feat, length, neg_shift, train=False, max_rows_per_tile=512):
    if train:
        # TODO(synk): train path (mask_with_length, pack_padded_sequence + 2-layer
        # LSTM, count_NCE_loss) -- helper modules are not defined in the reference
        # source, so only the eval path is implemented.
        raise NotImplementedError("train=True path not implemented")

    B, T, Din = feat.shape
    reduce_times = len(params["reduce"])
    assert T % (2 ** reduce_times) == 0, \
        "T must be divisible by 2**reduce_times for the pair-concat reduces"
    Wp, bp = params["proj"]
    F = Wp.shape[1]

    M = B * T
    TM = _pick_row_tile(M, reduce_times, max_rows_per_tile)
    n_tiles = M // TM
    M_out = M // (2 ** reduce_times)
    TM_out = TM // (2 ** reduce_times)

    # bf16 operands (cast ONCE outside the kernel), f32 accumulation inside.
    x = feat.reshape(M, Din).astype(jnp.bfloat16)
    args = [x, Wp.astype(jnp.bfloat16), bp.reshape(1, F).astype(jnp.float32)]
    in_specs = [
        pl.BlockSpec((TM, Din), lambda i: (i, 0)),   # streamed per row tile
        pl.BlockSpec((Din, F), lambda i: (0, 0)),    # resident weight
        pl.BlockSpec((1, F), lambda i: (0, 0)),      # resident bias (loaded once)
    ]
    for (Wr, br) in params["reduce"]:
        args += [
            Wr[:F].astype(jnp.bfloat16),             # acts on even frame of each pair
            Wr[F:].astype(jnp.bfloat16),             # acts on odd frame of each pair
            br.reshape(1, F).astype(jnp.float32),
        ]
        in_specs += [
            pl.BlockSpec((F, F), lambda i: (0, 0)),
            pl.BlockSpec((F, F), lambda i: (0, 0)),
            pl.BlockSpec((1, F), lambda i: (0, 0)),
        ]

    flops = 2 * M * Din * F
    for l in range(reduce_times):
        flops += 2 * (M // (2 ** (l + 1))) * (2 * F) * F
    bytes_accessed = (
        M * Din * 2                                     # x (bf16)
        + (Din * F + reduce_times * 2 * F * F) * 2      # weights (bf16)
        + (reduce_times + 1) * F * 4                    # biases (f32)
        + M_out * F * 4                                 # output (f32)
    )

    kernel = _make_fused_cpc_kernel(reduce_times, TM, F)
    out = pl.pallas_call(
        kernel,
        out_shape=jax.ShapeDtypeStruct((M_out, F), feat.dtype),
        grid=(n_tiles,),
        in_specs=in_specs,
        out_specs=pl.BlockSpec((TM_out, F), lambda i: (i, 0)),
        scratch_shapes=[pltpu.VMEM((TM, F), jnp.float32)],
        compiler_params=pltpu.CompilerParams(
            dimension_semantics=("parallel",),          # shard tiles over v7x's 2 TCs
            vmem_limit_bytes=32 * 1024 * 1024,
        ),
        cost_estimate=pl.CostEstimate(
            flops=flops, transcendentals=0, bytes_accessed=bytes_accessed),
    )(*args)

    z = out.reshape(B, T // (2 ** reduce_times), F)

    # length / neg_shift bookkeeping (integer floor-div == .int() trunc for >=0)
    for _ in range(reduce_times):
        length = length // 2
        neg_shift = neg_shift // 2

    return None, z


# ---------------------------------------------------------------------------
# Pure-JAX references for correctness checks
# ---------------------------------------------------------------------------
def cpc_forward_ref(params, feat, bf16):
    cast = (lambda a: a.astype(jnp.bfloat16)) if bf16 else (lambda a: a)
    Wp, bp = params["proj"]
    z = jnp.dot(cast(feat), cast(Wp), preferred_element_type=jnp.float32) + bp
    for (Wr, br) in params["reduce"]:
        Bz, Tz, Fz = z.shape
        zp = z.reshape(Bz, Tz // 2, 2 * Fz)
        z = jnp.dot(cast(zp), cast(Wr), preferred_element_type=jnp.float32) + br
    return z


if __name__ == "__main__":
    key = jax.random.PRNGKey(0)
    k_feat, k_param = jax.random.split(key)

    # Small shapes; feat_dim=128 keeps the output lane-dense (multiple of 128).
    B, T, input_dim, feat_dim, reduce_times = 2, 64, 64, 128, 2

    feat = jax.random.normal(k_feat, (B, T, input_dim), dtype=jnp.float32)
    length = jnp.array([64, 48], dtype=jnp.int32)
    neg_shift = jnp.array([8, 8], dtype=jnp.int32)

    params = init_cpc_params(k_param, input_dim, feat_dim, reduce_times)

    # max_rows_per_tile=32 -> 4-step pipelined grid even at these tiny shapes.
    loss, z = cpc_forward(params, feat, length, neg_shift, train=False,
                          max_rows_per_tile=32)
    z = jax.block_until_ready(z)

    assert loss is None
    assert z.shape == (B, T // (2 ** reduce_times), feat_dim), z.shape

    # strict check vs a reference using the same bf16-operand / f32-accum math
    z_ref_bf16 = cpc_forward_ref(params, feat, bf16=True)
    assert jnp.allclose(z, z_ref_bf16, atol=5e-3, rtol=5e-3), \
        "mismatch vs bf16-matched JAX reference"

    # loose check vs the full-f32 reference (bf16 quantization noise only)
    z_ref_f32 = cpc_forward_ref(params, feat, bf16=False)
    assert jnp.allclose(z, z_ref_f32, atol=5e-2, rtol=5e-2), \
        "mismatch vs f32 JAX reference"

    print("KERNEL_OK")
</pallas_src>

<mosaic_0001>
module attributes {stable_mosaic.version = 11 : i64} {
  func.func @kernel(%arg0: i32, %arg1: memref<32x64xbf16, #tpu.memory_space<vmem>>, %arg2: memref<64x128xbf16, #tpu.memory_space<vmem>>, %arg3: memref<1x128xf32, #tpu.memory_space<vmem>>, %arg4: memref<128x128xbf16, #tpu.memory_space<vmem>>, %arg5: memref<128x128xbf16, #tpu.memory_space<vmem>>, %arg6: memref<1x128xf32, #tpu.memory_space<vmem>>, %arg7: memref<128x128xbf16, #tpu.memory_space<vmem>>, %arg8: memref<128x128xbf16, #tpu.memory_space<vmem>>, %arg9: memref<1x128xf32, #tpu.memory_space<vmem>>, %arg10: memref<8x128xf32, #tpu.memory_space<vmem>>, %arg11: memref<32x128xf32, #tpu.memory_space<vmem>>) attributes {dimension_semantics = [#tpu.dimension_semantics<parallel>], iteration_bounds = array<i64: 4>, scalar_prefetch = 0 : i64, scratch_operands = 1 : i64, tpu.core_type = #tpu.core_type<tc>, window_params = [{transform_indices = @transform_0, window_bounds = array<i64: 32, 64>}, {pipeline_mode = #tpu.pipeline_mode<synchronous>, transform_indices = @transform_1, window_bounds = array<i64: 64, 128>}, {pipeline_mode = #tpu.pipeline_mode<synchronous>, transform_indices = @transform_2, window_bounds = array<i64: 1, 128>}, {pipeline_mode = #tpu.pipeline_mode<synchronous>, transform_indices = @transform_3, window_bounds = array<i64: 128, 128>}, {pipeline_mode = #tpu.pipeline_mode<synchronous>, transform_indices = @transform_4, window_bounds = array<i64: 128, 128>}, {pipeline_mode = #tpu.pipeline_mode<synchronous>, transform_indices = @transform_5, window_bounds = array<i64: 1, 128>}, {pipeline_mode = #tpu.pipeline_mode<synchronous>, transform_indices = @transform_6, window_bounds = array<i64: 128, 128>}, {pipeline_mode = #tpu.pipeline_mode<synchronous>, transform_indices = @transform_7, window_bounds = array<i64: 128, 128>}, {pipeline_mode = #tpu.pipeline_mode<synchronous>, transform_indices = @transform_8, window_bounds = array<i64: 1, 128>}, {transform_indices = @transform_9, window_bounds = array<i64: 8, 128>}]} {
    %c0 = arith.constant 0 : index
    %c0_0 = arith.constant 0 : index
    %0 = vector.load %arg1[%c0, %c0_0] : memref<32x64xbf16, #tpu.memory_space<vmem>>, vector<32x64xbf16>
    %c0_1 = arith.constant 0 : index
    %c0_2 = arith.constant 0 : index
    %1 = vector.load %arg2[%c0_1, %c0_2] : memref<64x128xbf16, #tpu.memory_space<vmem>>, vector<64x128xbf16>
    %cst = arith.constant dense<0.000000e+00> : vector<32x128xf32>
    %2 = tpu.matmul %0, %1, %cst {dimension_numbers = #tpu.dot_dimension_numbers<[1], [0], [0], [1], [0, 0, 1, 1], [], []>} : vector<32x64xbf16>, vector<64x128xbf16>, vector<32x128xf32> -> vector<32x128xf32>
    %c0_3 = arith.constant 0 : index
    %c0_4 = arith.constant 0 : index
    %3 = vector.load %arg3[%c0_3, %c0_4] : memref<1x128xf32, #tpu.memory_space<vmem>>, vector<1x128xf32>
    %4 = vector.broadcast %3 : vector<1x128xf32> to vector<32x128xf32>
    %5 = arith.addf %2, %4 : vector<32x128xf32>
    %c0_5 = arith.constant 0 : index
    %c0_6 = arith.constant 0 : index
    %6 = vector.load %arg11[%c0_5, %c0_6] : memref<32x128xf32, #tpu.memory_space<vmem>>, vector<32x128xf32>
    tpu.vector_store %arg11[%c0_5, %c0_6], %5 {strides = array<i32>} : memref<32x128xf32, #tpu.memory_space<vmem>>, vector<32x128xf32>,
    %c0_7 = arith.constant 0 : index
    %c0_8 = arith.constant 0 : index
    %7 = tpu.strided_load %arg11[%c0_7, %c0_8] {strides = array<i32: 2, 1>} : memref<32x128xf32, #tpu.memory_space<vmem>>, vector<16x128xf32>
    %8 = arith.truncf %7 : vector<16x128xf32> to vector<16x128xbf16>
    %c1 = arith.constant 1 : index
    %c0_9 = arith.constant 0 : index
    %9 = tpu.strided_load %arg11[%c1, %c0_9] {strides = array<i32: 2, 1>} : memref<32x128xf32, #tpu.memory_space<vmem>>, vector<16x128xf32>
    %10 = arith.truncf %9 : vector<16x128xf32> to vector<16x128xbf16>
    %c0_10 = arith.constant 0 : index
    %c0_11 = arith.constant 0 : index
    %11 = vector.load %arg4[%c0_10, %c0_11] : memref<128x128xbf16, #tpu.memory_space<vmem>>, vector<128x128xbf16>
    %cst_12 = arith.constant dense<0.000000e+00> : vector<16x128xf32>
    %12 = tpu.matmul %8, %11, %cst_12 {dimension_numbers = #tpu.dot_dimension_numbers<[1], [0], [0], [1], [0, 0, 1, 1], [], []>} : vector<16x128xbf16>, vector<128x128xbf16>, vector<16x128xf32> -> vector<16x128xf32>
    %c0_13 = arith.constant 0 : index
    %c0_14 = arith.constant 0 : index
    %13 = vector.load %arg5[%c0_13, %c0_14] : memref<128x128xbf16, #tpu.memory_space<vmem>>, vector<128x128xbf16>
    %cst_15 = arith.constant dense<0.000000e+00> : vector<16x128xf32>
    %14 = tpu.matmul %10, %13, %cst_15 {dimension_numbers = #tpu.dot_dimension_numbers<[1], [0], [0], [1], [0, 0, 1, 1], [], []>} : vector<16x128xbf16>, vector<128x128xbf16>, vector<16x128xf32> -> vector<16x128xf32>
    %15 = arith.addf %12, %14 : vector<16x128xf32>
    %c0_16 = arith.constant 0 : index
    %c0_17 = arith.constant 0 : index
    %16 = vector.load %arg6[%c0_16, %c0_17] : memref<1x128xf32, #tpu.memory_space<vmem>>, vector<1x128xf32>
    %17 = vector.broadcast %16 : vector<1x128xf32> to vector<16x128xf32>
    %18 = arith.addf %15, %17 : vector<16x128xf32>
    %c0_18 = arith.constant 0 : index
    %c0_19 = arith.constant 0 : index
    %19 = vector.load %arg11[%c0_18, %c0_19] : memref<32x128xf32, #tpu.memory_space<vmem>>, vector<16x128xf32>
    tpu.vector_store %arg11[%c0_18, %c0_19], %18 {strides = array<i32>} : memref<32x128xf32, #tpu.memory_space<vmem>>, vector<16x128xf32>,
    %c0_20 = arith.constant 0 : index
    %c0_21 = arith.constant 0 : index
    %20 = tpu.strided_load %arg11[%c0_20, %c0_21] {strides = array<i32: 2, 1>} : memref<32x128xf32, #tpu.memory_space<vmem>>, vector<8x128xf32>
    %21 = arith.truncf %20 : vector<8x128xf32> to vector<8x128xbf16>
    %c1_22 = arith.constant 1 : index
    %c0_23 = arith.constant 0 : index
    %22 = tpu.strided_load %arg11[%c1_22, %c0_23] {strides = array<i32: 2, 1>} : memref<32x128xf32, #tpu.memory_space<vmem>>, vector<8x128xf32>
    %23 = arith.truncf %22 : vector<8x128xf32> to vector<8x128xbf16>
    %c0_24 = arith.constant 0 : index
    %c0_25 = arith.constant 0 : index
    %24 = vector.load %arg7[%c0_24, %c0_25] : memref<128x128xbf16, #tpu.memory_space<vmem>>, vector<128x128xbf16>
    %cst_26 = arith.constant dense<0.000000e+00> : vector<8x128xf32>
    %25 = tpu.matmul %21, %24, %cst_26 {dimension_numbers = #tpu.dot_dimension_numbers<[1], [0], [0], [1], [0, 0, 1, 1], [], []>} : vector<8x128xbf16>, vector<128x128xbf16>, vector<8x128xf32> -> vector<8x128xf32>
    %c0_27 = arith.constant 0 : index
    %c0_28 = arith.constant 0 : index
    %26 = vector.load %arg8[%c0_27, %c0_28] : memref<128x128xbf16, #tpu.memory_space<vmem>>, vector<128x128xbf16>
    %cst_29 = arith.constant dense<0.000000e+00> : vector<8x128xf32>
    %27 = tpu.matmul %23, %26, %cst_29 {dimension_numbers = #tpu.dot_dimension_numbers<[1], [0], [0], [1], [0, 0, 1, 1], [], []>} : vector<8x128xbf16>, vector<128x128xbf16>, vector<8x128xf32> -> vector<8x128xf32>
    %28 = arith.addf %25, %27 : vector<8x128xf32>
    %c0_30 = arith.constant 0 : index
    %c0_31 = arith.constant 0 : index
    %29 = vector.load %arg9[%c0_30, %c0_31] : memref<1x128xf32, #tpu.memory_space<vmem>>, vector<1x128xf32>
    %30 = vector.broadcast %29 : vector<1x128xf32> to vector<8x128xf32>
    %31 = arith.addf %28, %30 : vector<8x128xf32>
    %c0_32 = arith.constant 0 : index
    %c0_33 = arith.constant 0 : index
    %32 = vector.load %arg11[%c0_32, %c0_33] : memref<32x128xf32, #tpu.memory_space<vmem>>, vector<8x128xf32>
    tpu.vector_store %arg11[%c0_32, %c0_33], %31 {strides = array<i32>} : memref<32x128xf32, #tpu.memory_space<vmem>>, vector<8x128xf32>,
    %c0_34 = arith.constant 0 : index
    %c0_35 = arith.constant 0 : index
    %33 = vector.load %arg11[%c0_34, %c0_35] : memref<32x128xf32, #tpu.memory_space<vmem>>, vector<8x128xf32>
    %c0_36 = arith.constant 0 : index
    %c0_37 = arith.constant 0 : index
    %34 = vector.load %arg10[%c0_36, %c0_37] : memref<8x128xf32, #tpu.memory_space<vmem>>, vector<8x128xf32>
    tpu.vector_store %arg10[%c0_36, %c0_37], %33 {strides = array<i32>} : memref<8x128xf32, #tpu.memory_space<vmem>>, vector<8x128xf32>,
    return
  }
  func.func @transform_0(%arg0: i32) -> (i32, i32) {
    %c0_i32 = arith.constant 0 : i32
    %c0_i32_0 = arith.constant 0 : i32
    return %arg0, %c0_i32 : i32, i32
  }
  func.func @transform_1(%arg0: i32) -> (i32, i32) {
    %c0_i32 = arith.constant 0 : i32
    %c0_i32_0 = arith.constant 0 : i32
    %c0_i32_1 = arith.constant 0 : i32
    return %c0_i32, %c0_i32_0 : i32, i32
  }
  func.func @transform_2(%arg0: i32) -> (i32, i32) {
    %c0_i32 = arith.constant 0 : i32
    %c0_i32_0 = arith.constant 0 : i32
    %c0_i32_1 = arith.constant 0 : i32
    return %c0_i32, %c0_i32_0 : i32, i32
  }
  func.func @transform_3(%arg0: i32) -> (i32, i32) {
    %c0_i32 = arith.constant 0 : i32
    %c0_i32_0 = arith.constant 0 : i32
    %c0_i32_1 = arith.constant 0 : i32
    return %c0_i32, %c0_i32_0 : i32, i32
  }
  func.func @transform_4(%arg0: i32) -> (i32, i32) {
    %c0_i32 = arith.constant 0 : i32
    %c0_i32_0 = arith.constant 0 : i32
    %c0_i32_1 = arith.constant 0 : i32
    return %c0_i32, %c0_i32_0 : i32, i32
  }
  func.func @transform_5(%arg0: i32) -> (i32, i32) {
    %c0_i32 = arith.constant 0 : i32
    %c0_i32_0 = arith.constant 0 : i32
    %c0_i32_1 = arith.constant 0 : i32
    return %c0_i32, %c0_i32_0 : i32, i32
  }
  func.func @transform_6(%arg0: i32) -> (i32, i32) {
    %c0_i32 = arith.constant 0 : i32
    %c0_i32_0 = arith.constant 0 : i32
    %c0_i32_1 = arith.constant 0 : i32
    return %c0_i32, %c0_i32_0 : i32, i32
  }
  func.func @transform_7(%arg0: i32) -> (i32, i32) {
    %c0_i32 = arith.constant 0 : i32
    %c0_i32_0 = arith.constant 0 : i32
    %c0_i32_1 = arith.constant 0 : i32
    return %c0_i32, %c0_i32_0 : i32, i32
  }
  func.func @transform_8(%arg0: i32) -> (i32, i32) {
    %c0_i32 = arith.constant 0 : i32
    %c0_i32_0 = arith.constant 0 : i32
    %c0_i32_1 = arith.constant 0 : i32
    return %c0_i32, %c0_i32_0 : i32, i32
  }
  func.func @transform_9(%arg0: i32) -> (i32, i32) {
    %c0_i32 = arith.constant 0 : i32
    %c0_i32_0 = arith.constant 0 : i32
    return %arg0, %c0_i32 : i32, i32
  }
}

</mosaic_0001>

<bundles_post_ra>
// kernel: tpu_custom_call.1
= control target key start
LH: loop header
LB: loop body
LE: loop exit
PB: predicated region body
PF: predicated region fallthrough
CT: control target
= control target key end

     0   :  { %14 = vsyncpa [#allocation4], 0  ;;  %s1794_s0 = inlined_call_operand.vmem [shape: bf16[128,64], index: 0, kind: input, shape index: {}]   ;;  %s1795_s1 = inlined_call_operand.vmem [shape: bf16[64,128], index: 1, kind: input, shape index: {}]   ;;  %s1796_s2 = inlined_call_operand.vmem [shape: f32[1,128], index: 2, kind: input, shape index: {}]   ;;  %s1797_s3 = inlined_call_operand.vmem [shape: bf16[128,128], index: 3, kind: input, shape index: {}]   ;;  %s1798_s4 = inlined_call_operand.hbm [shape: bf16[128,128], index: 4, kind: input, shape index: {}]   ;;  %s1799_s5 = inlined_call_operand.vmem [shape: f32[1,128], index: 5, kind: input, shape index: {}]   ;;  %s1800_s6 = inlined_call_operand.hbm [shape: bf16[128,128], index: 6, kind: input, shape index: {}]   ;;  %s1801_s7 = inlined_call_operand.hbm [shape: bf16[128,128], index: 7, kind: input, shape index: {}]   ;;  %s1802_s8 = inlined_call_operand.vmem [shape: f32[1,128], index: 8, kind: input, shape index: {}]   ;;  %s1803_s9 = inlined_call_operand.hbm [shape: f32[32,128], index: 9, kind: output, shape index: {}]  }
   0x1   :  { %15 = vsyncpa [#allocation7], 0 }
   0x2   :  { %16 = vsyncpa [#allocation5], 0 }
   0x3   :  { %18 = vsyncpa [#allocation5 + $0x1], 0  ;;  %s1560_s30 = smov 0   ;;  %s1562_s10 = smov 0  }
   0x4   :  { %s1564_s11 = smov 0   ;;  %s1566_s12 = smov 0  }
   0x5 LB: > { %s1581_s13 = sadd.s32 4294967295, %s1500_s12   ;;  %s1048_s14 = sadd.s32 4294967294, %s1500_s12   ;;  %s1500_s12 = sphi %s1566_s12, %s1819_s12   ;;  %s1496_s11 = sphi %s1564_s11, %s1818_s11   ;;  %s1492_s10 = sphi %s1562_s10, %s1817_s10   ;;  %s1488_s30 = sphi %s1560_s30, %s1816_s30  }
   0x6   : > { %s1585_s15 = sadd.s32 1, %s1500_s12   ;;  %s225_s16 = sadd.s32 1, %s1496_s11 }
   0x7   : > { %s222_s17 = ssub.s32 %s1500_s12, %s1585_s15  ;;  %p235_p0 = scmp.ne.s32.totalorder %s1496_s11, %s1492_s10 }
   0x8   : > { %p223_p1 = scmp.eq.s32.totalorder %s222_s17, 0  ;;  %p236_p2 = scmp.eq.s32.totalorder %s1581_s13, 3 }
   0x9   : > { %p241_p3 = scmp.ne.s32.totalorder %s1492_s10, %s1488_s30  ;;  %p242_p4 = scmp.eq.s32.totalorder %s1048_s14, 3 }
   0xa   : > { %s1596_s18 = scalar_select %p223_p1, %s1496_s11, %s225_s16  }
   0xb   : > { %p1598_p5 = por %p236_p2, %p235_p0  ;;  %p1602_p6 = por %p242_p4, %p241_p3 }
   0xc   : > { %p1049_p7 = scmp.ge.s32.totalorder %s1500_s12, 1  ;;  %p249_p8 = scmp.lt.s32.totalorder %s1500_s12, 5 }
   0xd   : > { %s1806_s19 = scalar_select %p1598_p5, 1, 0 }
   0xe   : > { %s1807_s20 = scalar_select %p1602_p6, 1, 0 }
   0xf   : > { %p1804_p9 = scmp.eq.s32.totalorder %s1581_s13, 0  ;;  %p1609_p10 = pnand %p1049_p7, %p249_p8 }
  0x10   : > { %s1502_s22 = smov [#allocation6]   ;;  %s1503_s25 = smov [#allocation3]  }
  0x11   : > { %p1256_p11 = pneg %p1609_p10  ;;  %s286_s23 = sshll.u32 %s1502_s22, 4  ;;  %s287_s23 = int_to_ptr.vmem [resolvable:$true] %s286_s23 }
  0x12   : > { %s270_s26 = sshll.u32 %s1503_s25, 4  ;;  %s1504_s27 = smov [#allocation8]   ;;  %s271_s26 = int_to_ptr.vmem [resolvable:$true] %s270_s26 }
  0x13   : > { %p1617_p12 = pnand %p1804_p9, %p1256_p11  ;;  %s299_s28 = sshll.u32 %s1504_s27, 4  ;;  %s300_s28 = int_to_ptr.vmem [resolvable:$true] %s299_s28 }
  0x14   : > { %s1365_s29 = scalar_lea.vmem %s287_s23, 1024  ;;  %p1373_p3 = scmp.lt.s32.totalorder %s287_s23, %s287_s23 }
  0x15   : > { %p1356_p13 = pneg %p1617_p12  ;;  %p1366_p0 = scmp.ne.s32.totalorder %s287_s23, %s1365_s29 }
  0x16   : > { %p1374_p4 = scmp.lt.s32.totalorder %s1365_s29, %s1365_s29 }
  0x17   : > { %p1368_p1 = pnand %p1366_p0, %p1356_p13 }
  0x18   : > { %p1375_p7 = por %p1374_p4, %p1373_p3 }
  0x19   : > { %p1369_p2 = pneg %p1368_p1 }
  0x1b   : > { %p1376_p8 = pnand %p1375_p7, %p1369_p2 }
  0x1d   : > { %1379 = shalt.err (!%p1376_p8)
}
  0x1e   : > { %s1505_s14 = smov 64   ;;  %s1506_s16 = smov 4  }
  0x1f   : > { %1262 = dma.hbm_to_vmem [thread:$0]  (!%p1617_p12), %s1800_s6, 1024, %s287_s23, [#allocation7], %s1505_s14, %s1505_s14, %s1506_s16  }
  0x20   : > { %s1391_s25 = scalar_lea.vmem %s271_s26, 1024  ;;  %p1399_p9 = scmp.lt.s32.totalorder %s271_s26, %s271_s26 }
  0x21   : > { %p1392_p11 = scmp.ne.s32.totalorder %s271_s26, %s1391_s25  ;;  %p1400_p6 = scmp.lt.s32.totalorder %s1391_s25, %s1391_s25 }
  0x23   : > { %p1394_p0 = pnand %p1392_p11, %p1356_p13  ;;  %p1401_p3 = por %p1400_p6, %p1399_p9 }
  0x25   : > { %p1395_p1 = pneg %p1394_p0 }
  0x27   : > { %p1402_p2 = pnand %p1401_p3, %p1395_p1 }
  0x29   : > { %1405 = shalt.err (!%p1402_p2)
}
  0x2a   : > { %1259 = dma.hbm_to_vmem [thread:$0]  (!%p1617_p12), %s1798_s4, 1024, %s271_s26, [#allocation4], %s1505_s14, %s1505_s14, %s1506_s16  }
  0x2b   : > { %s1417_s23 = scalar_lea.vmem %s300_s28, 1024  ;;  %p1425_p11 = scmp.lt.s32.totalorder %s300_s28, %s300_s28 }
  0x2c   : > { %p1418_p4 = scmp.ne.s32.totalorder %s300_s28, %s1417_s23  ;;  %p1426_p0 = scmp.lt.s32.totalorder %s1417_s23, %s1417_s23 }
  0x2e   : > { %p1420_p7 = pnand %p1418_p4, %p1356_p13  ;;  %p1427_p5 = por %p1426_p0, %p1425_p11 }
  0x30   : > { %p1421_p8 = pneg %p1420_p7 }
  0x32   : > { %p1428_p6 = pnand %p1427_p5, %p1421_p8 }
  0x34   : > { %1431 = shalt.err (!%p1428_p6)
}
  0x35   : > { %1265 = dma.hbm_to_vmem [thread:$0]  (!%p1617_p12), %s1801_s7, 1024, %s300_s28, [#allocation7], %s1505_s14, %s1505_s14, %s1506_s16  }
  0x36   : > { %327 = sbr.rel (%p1609_p10) target bundleno = 713 (0x2c9), region = 56  ;;  %p1810_p9 = scmp.eq.s32.totalorder (!%p1609_p10), %s1581_s13, 0 }
  0x3b   : > { %1475 = dma.done.wait (%p1810_p9), [#allocation4], 1024   ;;  %p1811_p13 = pmov %p1810_p9 }
  0x3c   : > { %p1812_p1 = pmov %p1810_p9 }
  0x3d   : > { %1477 = vsyncadd (%p1811_p13), [#allocation4], 4294966272 }
  0x3e   : > { %1479 = dma.done.wait (%p1812_p1), [#allocation7], 2048   ;;  %p1813_p5 = pmov %p1812_p1 }
  0x3f   : > { %s1059_s24 = sshll.u32 %s1581_s13, 2  ;;  %v1507_v0 = vmov 0.0   ;;  %v1316_v1 = vld [vmem:[%s1795_s1 + $0x18] sm:$0xff]   ;;  %v1317_v2 = vld [vmem:[%s1795_s1 + $0x10] sm:$0xff]   ;;  %v1318_v3 = vld [vmem:[%s1795_s1 + $0x8] sm:$0xff]   ;;  %vm431_vm0 = vcmask 523264  }
  0x40   : > { %1481 = vsyncadd (%p1813_p5), [#allocation7], 4294965248  ;;  %p372_p3 = scmp.lt.s32.totalorder %s1059_s24, 15  ;;  %1162 = vmatprep.subr.bf16.mxu1 %v1507_v0  ;;  %1150 = vmatprep.subr.bf16.mxu0 %v1316_v1  ;;  %v1322_v5 = vld [vmem:[#allocation3 + $0x38] sm:$0xff]   ;;  %v1319_v6 = vld [vmem:[%s1795_s1] sm:$0xff]   ;;  %vm1508_vm1 = vmmov 0  }
  0x41   : > { %1151 = vmatpush3.bf16.msra.mxu0 %v1316_v1  ;;  %1163 = vmatpush3.bf16.msra.mxu1 %v1322_v5  ;;  %v1324_v7 = vld [vmem:[#allocation3 + $0x30] sm:$0xff]   ;;  %v1326_v8 = vld [vmem:[#allocation3 + $0x28] sm:$0xff]   ;;  %v1323_v10 = vld [vmem:[%s1797_s3 + $0x38] sm:$0xff]   ;;  %s368_s23 = sand.u32 1, %s1492_s10   ;;  %p1814_p12 = scmp.ne.s32.totalorder %s1806_s19, 0 }
  0x42   : > { %s1821_s24 = smov (!%p372_p3, %s1059_s24), 15  ;;  %1152 = vmatprep.subr.bf16.mxu0 %v1317_v2  ;;  %1164 = vmatprep.subr.bf16.mxu1 %v1507_v0  ;;  %v1325_v11 = vld [vmem:[%s1797_s3 + $0x30] sm:$0xff]   ;;  %v1327_v12 = vld [vmem:[%s1797_s3 + $0x28] sm:$0xff]   ;;  %v1328_v13 = vld [vmem:[#allocation3 + $0x20] sm:$0xff]   ;;  %s1058_s17 = sshll.u32 %s368_s23, 3 }
  0x43   : > { %s1060_s21 = sshll.u32 %s1821_s24, 2  ;;  %v1329_v14 = vld [vmem:[%s1797_s3 + $0x20] sm:$0xff]   ;;  %v1330_v15 = vld [vmem:[#allocation3 + $0x18] sm:$0xff]   ;;  %v1332_v17 = vld [vmem:[#allocation3 + $0x10] sm:$0xff]   ;;  %1178 = vmatprep.mubr.msk.bf16.mxu1 %vm1508_vm1, %v1507_v0  ;;  %s370_s26 = scalar_lea.vmem [#allocation9], %s1058_s17 }
  0x44   : > { %s375_s29 = scalar_lea.vmem %s1794_s0, %s1060_s21  ;;  %v1331_v16 = vld [vmem:[%s1797_s3 + $0x18] sm:$0xff]   ;;  %v1333_v18 = vld [vmem:[%s1797_s3 + $0x10] sm:$0xff]   ;;  %v1334_v19 = vld [vmem:[#allocation3 + $0x8] sm:$0xff]   ;;  %s1105_s21 = sshll.u32 %s1581_s13, 7 }
  0x45   : > { %v1320_v4 = vld [vmem:[%s375_s29] sm:$0xff]   ;;  %1153 = vmatpush3.bf16.msra.mxu0 %v1317_v2  ;;  %v1321_v9 = vld [vmem:[%s375_s29 + $0x8] sm:$0xff]   ;;  %1165 = vmatpush3.bf16.msra.mxu1 %v1324_v7  ;;  %v1338_v33 = vld [vmem:[#allocation8 + $0x38] sm:$0xff]   ;;  %s958_s28 = sshll.u32 %s370_s26, 4  ;;  %s1753_s25 = scalar_lea.hbm %s1803_s9, %s1105_s21  ;;  %s1755_s28 = int_to_ptr.vmem [resolvable:$true] %s958_s28 }
  0x46   : > { %1158 = vmatprep.mubr.msk.bf16.mxu0 %vm431_vm0, %v1320_v4  ;;  %1154 = vmatprep.subr.bf16.mxu0 %v1318_v3  ;;  %v1335_v20 = vld [vmem:[%s1797_s3 + $0x8] sm:$0xff]   ;;  %v1336_v21 = vld [vmem:[#allocation3] sm:$0xff]   ;;  %v1339_v34 = vld [vmem:[#allocation6 + $0x38] sm:$0xff]   ;;  %s945_s13 = scalar_lea.sflag [#allocation5], %s368_s23  ;;  %s1432_s27 = scalar_lea.vmem %s1755_s28, 128 }
  0x47   : > { %1166 = vmatprep.subr.bf16.mxu1 %v1507_v0  ;;  %v1337_v22 = vld [vmem:[%s1797_s3] sm:$0xff]   ;;  %v1340_v40 = vld [vmem:[#allocation8 + $0x30] sm:$0xff]   ;;  %v1342_v42 = vld [vmem:[#allocation8 + $0x28] sm:$0xff]   ;;  %p1433_p10 = scmp.ne.s32.totalorder %s1755_s28, %s1432_s27  ;;  %s1509_s29 = smov [#allocation9]  }
  0x48   : > { %v1061_v23 = vld [vmem:[%s1796_s2] ss:$0 sm:$0xff]  ;;  %v1341_v41 = vld [vmem:[#allocation6 + $0x30] sm:$0xff]   ;;  %v1343_v43 = vld [vmem:[#allocation6 + $0x28] sm:$0xff]   ;;  %s1436_s17 = sshll.u32 %s1509_s29, 4  ;;  %s1437_s17 = int_to_ptr.vmem [resolvable:$false] %s1436_s17 }
  0x49   : > { %1155 = vmatpush3.bf16.msra.mxu0 %v1318_v3  ;;  %1167 = vmatpush3.bf16.msra.mxu1 %v1326_v8  ;;  %v1344_v44 = vld [vmem:[#allocation8 + $0x20] sm:$0xff]   ;;  %v1346_v46 = vld [vmem:[#allocation8 + $0x18] sm:$0xff]   ;;  %v1348_v48 = vld [vmem:[#allocation8 + $0x10] sm:$0xff]   ;;  %p1434_p2 = pnand %p1433_p10, %p1814_p12  ;;  %s1438_s22 = scalar_lea.vmem %s1437_s17, 256 }
  0x4a   : > { %1156 = vmatprep.subr.bf16.mxu0 %v1319_v6  ;;  %1168 = vmatprep.subr.bf16.mxu1 %v1507_v0  ;;  %v1345_v45 = vld [vmem:[#allocation6 + $0x20] sm:$0xff]   ;;  %v1347_v47 = vld [vmem:[#allocation6 + $0x18] sm:$0xff]   ;;  %v1349_v49 = vld [vmem:[#allocation6 + $0x10] sm:$0xff]   ;;  %p1439_p7 = scmp.lt.s32.totalorder %s1755_s28, %s1437_s17  ;;  %p1440_p8 = scmp.lt.s32.totalorder %s1438_s22, %s1432_s27 }
  0x4b   : > { %v1350_v50 = vld [vmem:[#allocation8 + $0x8] sm:$0xff]   ;;  %v1352_v52 = vld [vmem:[#allocation8] sm:$0xff]   ;;  %p1435_p4 = pneg %p1434_p2 }
  0x4c   : > { %v1351_v51 = vld [vmem:[#allocation6 + $0x8] sm:$0xff]   ;;  %v1353_v53 = vld [vmem:[#allocation6] sm:$0xff]   ;;  %p1441_p11 = por %p1440_p8, %p1439_p7 }
  0x4d   : > { %1157 = vmatpush3.bf16.msra.mxu0 %v1319_v6  ;;  %1169 = vmatpush3.bf16.msra.mxu1 %v1328_v13  ;;  %v1086_v56 = vld [vmem:[%s1799_s5] ss:$0 sm:$0xff] }
  0x4e   : > { %1182 = vmatprep.subr.bf16.mxu0 %v1507_v0  ;;  %1170 = vmatprep.subr.bf16.mxu1 %v1507_v0  ;;  %p1442_p0 = pnand %p1441_p11, %p1435_p4 }
  0x50   : > { %1159 = vmatmul.mubr.msk.bf16.vlgmr.msra.gmra.mxu0 %vm431_vm0, %v1321_v9  ;;  %v1103_v9 = vld [vmem:[%s1802_s8] ss:$0 sm:$0xff] }
  0x51   : > { %1183 = vmatpush3.bf16.msra.mxu0 %v1323_v10  ;;  %1171 = vmatpush3.bf16.msra.mxu1 %v1330_v15 }
  0x52   : > { %1184 = vmatprep.subr.bf16.mxu0 %v1507_v0  ;;  %1172 = vmatprep.subr.bf16.mxu1 %v1507_v0 }
  0x53   : > { %1198 = vmatprep.mubr.msk.bf16.mxu0 %vm1508_vm1, %v1507_v0 }
  0x55   : > { %1185 = vmatpush3.bf16.msra.mxu0 %v1325_v11  ;;  %1173 = vmatpush3.bf16.msra.mxu1 %v1332_v17 }
  0x56   : > { %1186 = vmatprep.subr.bf16.mxu0 %v1507_v0  ;;  %1174 = vmatprep.subr.bf16.mxu1 %v1507_v0 }
  0x59   : > { %1187 = vmatpush3.bf16.msra.mxu0 %v1327_v12  ;;  %1175 = vmatpush3.bf16.msra.mxu1 %v1334_v19 }
  0x5a   : > { %1188 = vmatprep.subr.bf16.mxu0 %v1507_v0  ;;  %1176 = vmatprep.subr.bf16.mxu1 %v1507_v0 }
  0x5d   : > { %1189 = vmatpush3.bf16.msra.mxu0 %v1329_v14  ;;  %1177 = vmatpush3.bf16.msra.mxu1 %v1336_v21 }
  0x5e   : > { %1190 = vmatprep.subr.bf16.mxu0 %v1507_v0  ;;  %1202 = vmatprep.subr.bf16.mxu1 %v1507_v0 }
  0x61   : > { %1191 = vmatpush3.bf16.msra.mxu0 %v1331_v16 }
  0x62   : > { %1192 = vmatprep.subr.bf16.mxu0 %v1507_v0 }
  0x65   : > { %1193 = vmatpush3.bf16.msra.mxu0 %v1333_v18 }
  0x66   : > { %1194 = vmatprep.subr.bf16.mxu0 %v1507_v0 }
  0x69   : > { %1195 = vmatpush3.bf16.msra.mxu0 %v1335_v20 }
  0x6a   : > { %1196 = vmatprep.subr.bf16.mxu0 %v1507_v0 }
  0x6d   : > { %1197 = vmatpush3.bf16.msra.mxu0 %v1337_v22 }
  0x6e   : > { %1222 = vmatprep.subr.bf16.mxu0 %v1507_v0 }
 0x110   : > { %v1160_v24 = vpop.f32.mrf.mxu0 }
 0x111   : > { %v481_v25 = vadd.f32 %v1160_v24, %v1061_v23 }
 0x112   : > { %v472_v26 = vpop.f32.mrf.mxu0 }
 0x113   : > { %489 = vst [vmem:[#allocation2 + $0x10] sm:$0xff] %v481_v25  ;;  %v473_v27 = vadd.f32 %v1061_v23, %v472_v26 }
 0x114   : > { %v1161_v28 = vpop.f32.mrf.mxu0 }
 0x115   : > { %487 = vst [vmem:[#allocation2] sm:$0xff] %v473_v27  ;;  %v484_v29 = vadd.f32 %v1161_v28, %v1061_v23 }
 0x116   : > { %v475_v30 = vpop.f32.mrf.mxu0 }
 0x117   : > { %490 = vst [vmem:[#allocation2 + $0x18] sm:$0xff] %v484_v29  ;;  %v476_v31 = vadd.f32 %v1061_v23, %v475_v30 }
 0x119   : > { %488 = vst [vmem:[#allocation2 + $0x8] sm:$0xff] %v476_v31 }
 0x11e   : > { %v498_v32 = vld [vmem:[#allocation2 + $0x11] ss:$2 sm:$0xff]  ;;  %v493_v37 = vld [vmem:[#allocation2 + $0x10] ss:$2 sm:$0xff] }
 0x120   : > { %v496_v35 = vld [vmem:[#allocation2 + $0x1] ss:$2 sm:$0xff]  ;;  %v491_v36 = vld [vmem:[#allocation2] ss:$2 sm:$0xff] }
 0x121   : > { %v499_v38 = vpack.c.bf16 %v498_v32, %v496_v35  ;;  %v494_v39 = vpack.c.bf16 %v493_v37, %v491_v36 }
 0x123   : > { %1179 = vmatmul.mubr.bf16.vlgmr.msra.gmra.mxu1 %v499_v38  ;;  %1199 = vmatmul.mubr.bf16.vlgmr.msra.gmra.mxu0 %v494_v39 }
 0x124   : > { %1203 = vmatpush3.bf16.msra.mxu1 %v1338_v33  ;;  %1223 = vmatpush3.bf16.msra.mxu0 %v1339_v34 }
 0x125   : > { %1204 = vmatprep.subr.bf16.mxu1 %v1507_v0  ;;  %1224 = vmatprep.subr.bf16.mxu0 %v1507_v0 }
 0x126   : > { %1218 = vmatprep.mubr.msk.bf16.mxu1 %vm1508_vm1, %v1507_v0  ;;  %1238 = vmatprep.mubr.msk.bf16.mxu0 %vm1508_vm1, %v1507_v0 }
 0x128   : > { %1205 = vmatpush3.bf16.msra.mxu1 %v1340_v40  ;;  %1225 = vmatpush3.bf16.msra.mxu0 %v1341_v41 }
 0x129   : > { %1206 = vmatprep.subr.bf16.mxu1 %v1507_v0  ;;  %1226 = vmatprep.subr.bf16.mxu0 %v1507_v0 }
 0x12c   : > { %1207 = vmatpush3.bf16.msra.mxu1 %v1342_v42  ;;  %1227 = vmatpush3.bf16.msra.mxu0 %v1343_v43 }
 0x12d   : > { %1208 = vmatprep.subr.bf16.mxu1 %v1507_v0  ;;  %1228 = vmatprep.subr.bf16.mxu0 %v1507_v0 }
 0x130   : > { %1209 = vmatpush3.bf16.msra.mxu1 %v1344_v44  ;;  %1229 = vmatpush3.bf16.msra.mxu0 %v1345_v45 }
 0x131   : > { %1210 = vmatprep.subr.bf16.mxu1 %v1507_v0  ;;  %1230 = vmatprep.subr.bf16.mxu0 %v1507_v0 }
 0x134   : > { %1211 = vmatpush3.bf16.msra.mxu1 %v1346_v46  ;;  %1231 = vmatpush3.bf16.msra.mxu0 %v1347_v47 }
 0x135   : > { %1212 = vmatprep.subr.bf16.mxu1 %v1507_v0  ;;  %1232 = vmatprep.subr.bf16.mxu0 %v1507_v0 }
 0x138   : > { %1213 = vmatpush3.bf16.msra.mxu1 %v1348_v48  ;;  %1233 = vmatpush3.bf16.msra.mxu0 %v1349_v49 }
 0x139   : > { %1214 = vmatprep.subr.bf16.mxu1 %v1507_v0  ;;  %1234 = vmatprep.subr.bf16.mxu0 %v1507_v0 }
 0x13c   : > { %1215 = vmatpush3.bf16.msra.mxu1 %v1350_v50  ;;  %1235 = vmatpush3.bf16.msra.mxu0 %v1351_v51 }
 0x13d   : > { %1216 = vmatprep.subr.bf16.mxu1 %v1507_v0  ;;  %1236 = vmatprep.subr.bf16.mxu0 %v1507_v0 }
 0x140   : > { %1217 = vmatpush3.bf16.msra.mxu1 %v1352_v52  ;;  %1237 = vmatpush3.bf16.msra.mxu0 %v1353_v53 }
 0x1e3   : > { %v614_v54 = vpop.f32.mrf.mxu1  ;;  %v703_v55 = vpop.f32.mrf.mxu0 }
 0x1e4   : > { %v704_v57 = vadd.f32 %v703_v55, %v614_v54 }
 0x1e5   : > { %v1180_v58 = vpop.f32.mrf.mxu1  ;;  %v1200_v59 = vpop.f32.mrf.mxu0 }
 0x1e6   : > { %v717_v60 = vadd.f32 %v1086_v56, %v704_v57 }
 0x1e7   : > { %v617_v61 = vpop.f32.mrf.mxu1  ;;  %v706_v62 = vpop.f32.mrf.mxu0 }
 0x1e8   : > { %719 = vst [vmem:[#allocation2] sm:$0xff] %v717_v60  ;;  %v707_v63 = vadd.f32 %v706_v62, %v617_v61 }
 0x1e9   : > { %v1181_v1 = vpop.f32.mrf.mxu1  ;;  %v1201_v0 = vpop.f32.mrf.mxu0 }
 0x1ea   : > { %v718_v2 = vadd.f32 %v1086_v56, %v707_v63 }
 0x1ec   : > { %720 = vst [vmem:[#allocation2 + $0x8] sm:$0xff] %v718_v2 }
 0x1f3   : > { %v723_v3 = vld [vmem:[#allocation2 + $0x1] ss:$2 sm:$0xff]  ;;  %v721_v4 = vld [vmem:[#allocation2] ss:$2 sm:$0xff] }
 0x1f4   : > { %v724_v5 = vpack.c.bf16 %v723_v3, %v723_v3  ;;  %v722_v6 = vpack.c.bf16 %v721_v4, %v721_v4 }
 0x1f6   : > { %1219 = vmatmul.mubr.bf16.vlgmr.msra.gmra.mxu1 %v724_v5  ;;  %1239 = vmatmul.mubr.bf16.vlgmr.msra.gmra.mxu0 %v722_v6 }
 0x2b6   : > { %v839_v7 = vpop.f32.mrf.mxu1  ;;  %v927_v8 = vpop.f32.mrf.mxu0 }
 0x2b7   : > { %v928_v10 = vadd.f32 %v927_v8, %v839_v7 }
 0x2b8   : > { %v1220_v11 = vpop.f32.mrf.mxu1  ;;  %v1240_v12 = vpop.f32.mrf.mxu0 }
 0x2b9   : > { %v940_v13 = vadd.f32 %v1103_v9, %v928_v10 }
 0x2ba   : > { %v842_v14 = vpop.f32.mrf.mxu1  ;;  %v930_v15 = vpop.f32.mrf.mxu0 }
 0x2bb   : > { %941 = vst [vmem:[#allocation2] sm:$0xff] %v940_v13  ;;  %943 = vst [vmem:[%s370_s26] sm:$0xff] %v940_v13 }
 0x2bc   : > { %v1221_v16 = vpop.f32.mrf.mxu1  ;;  %v1241_v17 = vpop.f32.mrf.mxu0 }
 0x2bd   : > { %1445 = shalt.err (!%p1442_p0)
}
 0x2be   : > { %s1446_s24 = scalar_lea.hbm %s1753_s25, 128  ;;  %s1450_s26 = scalar_lea.hbm %s1803_s9, 512 }
 0x2bf   : > { %p1447_p6 = scmp.ne.s32.totalorder %s1753_s25, %s1446_s24  ;;  %p1451_p1 = scmp.lt.s32.totalorder %s1753_s25, %s1803_s9 }
 0x2c0   : > { %p1452_p5 = scmp.lt.s32.totalorder %s1450_s26, %s1446_s24 }
 0x2c1   : > { %p1448_p9 = pnand %p1447_p6, %p1814_p12 }
 0x2c2   : > { %p1453_p3 = por %p1452_p5, %p1451_p1 }
 0x2c3   : > { %p1449_p13 = pneg %p1448_p9 }
 0x2c5   : > { %p1454_p10 = pnand %p1453_p3, %p1449_p13 }
 0x2c7   : > { %1457 = shalt.err (!%p1454_p10)
}
 0x2c8   : > { %1254 = dma.vmem_to_hbm [thread:$0]  (%p1814_p12), %s1755_s28, 128, %s1753_s25, %s945_s13  }
 0x2c9 PF: > { %p1276_p2 = scmp.ge.s32.totalorder %s1500_s12, 2  ;;  %s970_s27 = sand.u32 1, %s1488_s30  }
 0x2ca   : > { %p1815_p4 = scmp.ne.s32.totalorder %s1807_s20, 0  ;;  %s971_s29 = scalar_lea.sflag [#allocation5], %s970_s27 }
 0x2cc   : > { %p1267_p7 = pnand %p1276_p2, %p1815_p4 }
 0x2ce   : > { %p1268_p8 = pneg %p1267_p7 }
 0x2d0   : > { %1483 = dma.done.wait (%p1268_p8), %s971_s29, 128  }
 0x2d1   : > { %1485 = vsyncadd (%p1268_p8), %s971_s29, 4294967168  ;;  %p21_p11 = scmp.ge.s32.totalorder %s1585_s15, 6   ;;  %s1816_s30 = smov %s1492_s10 }
 0x2d2   : > { %s1817_s10 = smov %s1496_s11  ;;  %s1818_s11 = smov %s1596_s18 }
 0x2d3   : > { %s1819_s12 = smov %s1585_s15  ;;  %23 = sbr.rel (!%p21_p11) target bundleno = 5 (0x5), region = 107 }
 0x2d8   :  { %976 = vsyncpa [#allocation4], 1 }
 0x2d9   :  { %978 = vsyncpa [#allocation4 + $0x1], 1 }
 0x2da   :  { %979 = vsyncpa [#allocation7], 1 }
 0x2db   :  { %980 = vsyncpa [#allocation5], 1 }
 0x2dc   :  { %982 = vsyncpa [#allocation5 + $0x1], 1 }

</bundles_post_ra>
